<compile_context>
chip_gen: v7x
topology: tpu7x:2x2x1
jax: 0.10.0
libtpu: 0.0.40
codegen_flags: <defaults>
</compile_context>

<pallas_src>
import functools

import jax
import jax.numpy as jnp
from jax import lax
from jax.experimental import pallas as pl
from jax.experimental.pallas import tpu as pltpu

# Keep XLA-side f32 matmuls at full float32 precision so the plain-JAX
# reference (and the kernel when executed in interpret mode) matches the
# Mosaic f32 MXU matmul to ~ulp level instead of bf16-pass error.
jax.config.update("jax_default_matmul_precision", "highest")


def _round_up(x, m):
    return ((x + m - 1) // m) * m


def _graph_constructor_kernel(nv1_ref, nv2_ref, w1_ref, b1_ref, w2_ref, b2_ref,
                              adj_ref, *, alpha, k, n_valid, n_col):
    f32 = jnp.float32
    alpha = f32(alpha)
    n_row = nv1_ref.shape[0]

    # nodevec = tanh(alpha * (emb(idx) @ W + b)); W pre-transposed to [in, out].
    nv1 = jnp.tanh(alpha * (jnp.dot(nv1_ref[...], w1_ref[...],
                                    preferred_element_type=f32) + b1_ref[...]))
    nv2 = jnp.tanh(alpha * (jnp.dot(nv2_ref[...], w2_ref[...],
                                    preferred_element_type=f32) + b2_ref[...]))

    # a[i,j] = nv1[i].nv2[j] - nv2[i].nv1[j] with ONE MXU matmul over
    # feature-concatenated operands (contraction depth 2*d_pad = 256 fills the
    # v6e/v7x MXU; no [N,N] XLU transpose, no N^2 VPU subtract).  The column
    # operand is zero-padded to n_col rows so padded columns of `a` are 0.
    row_op = jnp.concatenate([nv1, -nv2], axis=1)             # [n_row, 2*d_pad]
    col_op = jnp.concatenate([nv2, nv1], axis=1)              # [n_row, 2*d_pad]
    if n_col > n_row:
        col_op = jnp.concatenate(
            [col_op, jnp.zeros((n_col - n_row, col_op.shape[1]), f32)], axis=0)
    a = lax.dot_general(row_op, col_op,
                        dimension_numbers=(((1,), (1,)), ((), ())),
                        preferred_element_type=f32)           # [n_row, n_col]
    adj = jax.nn.relu(jnp.tanh(alpha * a))

    # --- per-row top-k keep mask -------------------------------------------
    # Exactly one column selected per row per step; ties broken by lowest
    # column index (same rule as lax.top_k / torch.topk).  Padded columns are
    # excluded via a cheap (1, n_col) lane mask broadcast (no N^2 iota).
    lane_i = lax.broadcasted_iota(jnp.int32, (1, n_col), 1)
    lane_f = lane_i.astype(f32)
    valid = lane_i < n_valid                                  # (1, n_col)
    removed = f32(-1.0)                                       # adj >= 0 always
    work = jnp.where(valid, adj, removed)
    for _ in range(k):                                        # k: small static int
        row_max = jnp.max(work, axis=1, keepdims=True)        # XLU reduce
        tied = work == row_max
        cand = jnp.where(tied, lane_f, f32(n_col))
        min_idx = jnp.min(cand, axis=1, keepdims=True)        # lowest tied index
        sel = lane_f == min_idx                               # one col per row
        work = jnp.where(sel, removed, work)
    # Kept entries are exactly the (valid) entries knocked out during the loop.
    keep = jnp.logical_and(work < f32(0.0), valid)
    adj_ref[...] = jnp.where(keep, adj, f32(0.0))


def make_graph_constructor(emb1, emb2, w1, b1, w2, b2, *, alpha, k):
    """Returns a jitted ``idx -> adjacency`` function.

    Static weight prep (transpose to [in, out], lane padding) is hoisted here,
    so the per-call path is just: embedding gather + activation padding + one
    pallas_call, all inside a single jitted graph.
    """
    dim = int(emb1.shape[1])
    d_pad = _round_up(dim, 128)

    def pad2(x, rows, cols):
        x = jnp.asarray(x, jnp.float32)
        return jnp.pad(x, ((0, rows - x.shape[0]), (0, cols - x.shape[1])))

    # nn.Linear stores W as [out, in]; pre-transpose so the kernel does x @ W.
    w1t = pad2(jnp.asarray(w1).T, d_pad, d_pad)
    w2t = pad2(jnp.asarray(w2).T, d_pad, d_pad)
    b1p = pad2(jnp.asarray(b1).reshape(1, -1), 1, d_pad)
    b2p = pad2(jnp.asarray(b2).reshape(1, -1), 1, d_pad)
    emb1f = jnp.asarray(emb1, jnp.float32)
    emb2f = jnp.asarray(emb2, jnp.float32)

    @jax.jit
    def forward(idx):
        n = int(idx.shape[0])
        n_row = _round_up(n, 8)        # sublane padding only (f32 tile = 8)
        n_col = _round_up(n, 128)      # lane-dense output columns
        # Embedding gather is plain-JAX glue fused into the jitted graph.
        nv1 = pad2(emb1f[idx, :], n_row, d_pad)
        nv2 = pad2(emb2f[idx, :], n_row, d_pad)

        kernel = functools.partial(
            _graph_constructor_kernel,
            alpha=float(alpha), k=int(k), n_valid=n, n_col=n_col)
        vmem = pl.BlockSpec(memory_space=pltpu.MemorySpace.VMEM)
        adj_p = pl.pallas_call(
            kernel,
            out_shape=jax.ShapeDtypeStruct((n_row, n_col), jnp.float32),
            in_specs=[vmem] * 6,
            out_specs=vmem,
        )(nv1, nv2, w1t, b1p, w2t, b2p)
        # Padded rows/columns never leak into real entries; slice them away.
        return adj_p[:n, :n]

    return forward


def _reference_forward(idx, emb1, emb2, w1, b1, w2, b2, *, alpha, k):
    """Plain-JAX transcription of GraphConstructor.forward (embedding branch)."""
    prec = lax.Precision.HIGHEST
    nv1 = jnp.tanh(alpha * (jnp.dot(emb1[idx], w1.T, precision=prec) + b1))
    nv2 = jnp.tanh(alpha * (jnp.dot(emb2[idx], w2.T, precision=prec) + b2))
    a = (jnp.dot(nv1, nv2.T, precision=prec)
         - jnp.dot(nv2, nv1.T, precision=prec))
    adj = jax.nn.relu(jnp.tanh(alpha * a))
    _, top_idx = lax.top_k(adj, k)             # ties -> lowest index
    rows = jnp.arange(adj.shape[0])[:, None]
    mask = jnp.zeros_like(adj).at[rows, top_idx].set(1.0)
    return adj * mask


if __name__ == "__main__":
    nnodes, dim, k, alpha = 16, 32, 4, 3.0

    key = jax.random.PRNGKey(0)
    k1, k2, k3, k4, k5, k6 = jax.random.split(key, 6)

    # nn.Embedding(nnodes, dim) x2, nn.Linear(dim, dim) x2 -- synthetic init.
    emb1 = jax.random.normal(k1, (nnodes, dim), dtype=jnp.float32)
    emb2 = jax.random.normal(k2, (nnodes, dim), dtype=jnp.float32)
    w1 = jax.random.normal(k3, (dim, dim), dtype=jnp.float32) * 0.1   # [out, in]
    b1 = jax.random.normal(k4, (dim,), dtype=jnp.float32) * 0.1
    w2 = jax.random.normal(k5, (dim, dim), dtype=jnp.float32) * 0.1
    b2 = jax.random.normal(k6, (dim,), dtype=jnp.float32) * 0.1

    idx = jnp.arange(nnodes, dtype=jnp.int32)

    forward = make_graph_constructor(emb1, emb2, w1, b1, w2, b2,
                                     alpha=alpha, k=k)
    adj = jax.block_until_ready(forward(idx))

    ref = _reference_forward(idx, emb1, emb2, w1, b1, w2, b2, alpha=alpha, k=k)
    assert adj.shape == (nnodes, nnodes)
    # Tolerance covers f32 accumulation-order differences between the fused
    # kernel (single 256-deep contraction) and the unfused reference; a wrong
    # top-k selection would show up as an O(1) error.
    assert jnp.allclose(adj, ref, atol=1e-3, rtol=1e-3), "mismatch vs reference"
    # At most k kept (positive) entries per row.
    assert int((adj > 0).sum(axis=1).max()) <= k

    print("KERNEL_OK")
</pallas_src>

<mosaic_0001>
module attributes {stable_mosaic.version = 11 : i64} {
  func.func @_graph_constructor_kernel(%arg0: memref<16x128xf32, #tpu.memory_space<vmem>>, %arg1: memref<16x128xf32, #tpu.memory_space<vmem>>, %arg2: memref<128x128xf32, #tpu.memory_space<vmem>>, %arg3: memref<1x128xf32, #tpu.memory_space<vmem>>, %arg4: memref<128x128xf32, #tpu.memory_space<vmem>>, %arg5: memref<1x128xf32, #tpu.memory_space<vmem>>, %arg6: memref<16x128xf32, #tpu.memory_space<vmem>>) attributes {dimension_semantics = [], scalar_prefetch = 0 : i64, scratch_operands = 0 : i64, tpu.core_type = #tpu.core_type<tc>} {
    %c0 = arith.constant 0 : index
    %c0_0 = arith.constant 0 : index
    %0 = vector.load %arg0[%c0, %c0_0] : memref<16x128xf32, #tpu.memory_space<vmem>>, vector<16x128xf32>
    %c0_1 = arith.constant 0 : index
    %c0_2 = arith.constant 0 : index
    %1 = vector.load %arg2[%c0_1, %c0_2] : memref<128x128xf32, #tpu.memory_space<vmem>>, vector<128x128xf32>
    %cst = arith.constant dense<0.000000e+00> : vector<16x128xf32>
    %2 = tpu.matmul %0, %1, %cst {dimension_numbers = #tpu.dot_dimension_numbers<[1], [0], [0], [1], [0, 0, 1, 1], [], []>, precision = #tpu.contract_precision<fp32>} : vector<16x128xf32>, vector<128x128xf32>, vector<16x128xf32> -> vector<16x128xf32>
    %c0_3 = arith.constant 0 : index
    %c0_4 = arith.constant 0 : index
    %3 = vector.load %arg3[%c0_3, %c0_4] : memref<1x128xf32, #tpu.memory_space<vmem>>, vector<1x128xf32>
    %4 = vector.broadcast %3 : vector<1x128xf32> to vector<16x128xf32>
    %5 = arith.addf %2, %4 : vector<16x128xf32>
    %cst_5 = arith.constant 3.000000e+00 : f32
    %6 = vector.broadcast %cst_5 : f32 to vector<16x128xf32>
    %7 = arith.mulf %6, %5 : vector<16x128xf32>
    %8 = math.tanh %7 : vector<16x128xf32>
    %c0_6 = arith.constant 0 : index
    %c0_7 = arith.constant 0 : index
    %9 = vector.load %arg1[%c0_6, %c0_7] : memref<16x128xf32, #tpu.memory_space<vmem>>, vector<16x128xf32>
    %c0_8 = arith.constant 0 : index
    %c0_9 = arith.constant 0 : index
    %10 = vector.load %arg4[%c0_8, %c0_9] : memref<128x128xf32, #tpu.memory_space<vmem>>, vector<128x128xf32>
    %cst_10 = arith.constant dense<0.000000e+00> : vector<16x128xf32>
    %11 = tpu.matmul %9, %10, %cst_10 {dimension_numbers = #tpu.dot_dimension_numbers<[1], [0], [0], [1], [0, 0, 1, 1], [], []>, precision = #tpu.contract_precision<fp32>} : vector<16x128xf32>, vector<128x128xf32>, vector<16x128xf32> -> vector<16x128xf32>
    %c0_11 = arith.constant 0 : index
    %c0_12 = arith.constant 0 : index
    %12 = vector.load %arg5[%c0_11, %c0_12] : memref<1x128xf32, #tpu.memory_space<vmem>>, vector<1x128xf32>
    %13 = vector.broadcast %12 : vector<1x128xf32> to vector<16x128xf32>
    %14 = arith.addf %11, %13 : vector<16x128xf32>
    %cst_13 = arith.constant 3.000000e+00 : f32
    %15 = vector.broadcast %cst_13 : f32 to vector<16x128xf32>
    %16 = arith.mulf %15, %14 : vector<16x128xf32>
    %17 = math.tanh %16 : vector<16x128xf32>
    %cst_14 = arith.constant 0.000000e+00 : f32
    %18 = vector.broadcast %cst_14 : f32 to vector<16x128xf32>
    %19 = arith.subf %18, %17 : vector<16x128xf32>
    %20 = tpu.concatenate %8, %19 in 1 : vector<16x128xf32>, vector<16x128xf32> -> vector<16x256xf32>
    %21 = tpu.concatenate %17, %8 in 1 : vector<16x128xf32>, vector<16x128xf32> -> vector<16x256xf32>
    %cst_15 = arith.constant 0.000000e+00 : f32
    %22 = vector.broadcast %cst_15 : f32 to vector<112x256xf32>
    %23 = tpu.concatenate %21, %22 in 0 : vector<16x256xf32>, vector<112x256xf32> -> vector<128x256xf32>
    %cst_16 = arith.constant dense<0.000000e+00> : vector<16x128xf32>
    %24 = tpu.matmul %20, %23, %cst_16 {dimension_numbers = #tpu.dot_dimension_numbers<[1], [1], [0], [0], [0, 0, 1, 0], [], []>, precision = #tpu.contract_precision<fp32>} : vector<16x256xf32>, vector<128x256xf32>, vector<16x128xf32> -> vector<16x128xf32>
    %cst_17 = arith.constant 3.000000e+00 : f32
    %25 = vector.broadcast %cst_17 : f32 to vector<16x128xf32>
    %26 = arith.mulf %25, %24 : vector<16x128xf32>
    %27 = math.tanh %26 : vector<16x128xf32>
    %cst_18 = arith.constant 0.000000e+00 : f32
    %28 = vector.broadcast %cst_18 : f32 to vector<16x128xf32>
    %29 = arith.maximumf %27, %28 : vector<16x128xf32>
    %30 = tpu.iota {dimensions = array<i32: 1>} : vector<1x128xi32>
    %31 = arith.sitofp %30 : vector<1x128xi32> to vector<1x128xf32>
    %c16_i32 = arith.constant 16 : i32
    %32 = vector.broadcast %c16_i32 : i32 to vector<1x128xi32>
    %33 = arith.cmpi slt, %30, %32 : vector<1x128xi32>
    %cst_19 = arith.constant -1.000000e+00 : f32
    %34 = vector.shape_cast %33 : vector<1x128xi1> to vector<1x128xi1>
    %35 = vector.broadcast %34 : vector<1x128xi1> to vector<16x128xi1>
    %36 = vector.broadcast %cst_19 : f32 to vector<16x128xf32>
    %37 = arith.select %35, %29, %36 : vector<16x128xi1>, vector<16x128xf32>
    %cst_20 = arith.constant dense<0xFF800000> : vector<16xf32>
    %38 = vector.multi_reduction <maximumf>, %37, %cst_20 [1] : vector<16x128xf32> to vector<16xf32>
    %39 = vector.shape_cast %38 : vector<16xf32> to vector<16x1xf32>
    %40 = vector.broadcast %39 : vector<16x1xf32> to vector<16x128xf32>
    %41 = arith.cmpf oeq, %37, %40 : vector<16x128xf32>
    %cst_21 = arith.constant 1.280000e+02 : f32
    %42 = vector.shape_cast %31 : vector<1x128xf32> to vector<1x128xf32>
    %43 = vector.broadcast %42 : vector<1x128xf32> to vector<16x128xf32>
    %44 = vector.broadcast %cst_21 : f32 to vector<16x128xf32>
    %45 = arith.select %41, %43, %44 : vector<16x128xi1>, vector<16x128xf32>
    %cst_22 = arith.constant dense<0x7F800000> : vector<16xf32>
    %46 = vector.multi_reduction <minimumf>, %45, %cst_22 [1] : vector<16x128xf32> to vector<16xf32>
    %47 = vector.shape_cast %46 : vector<16xf32> to vector<16x1xf32>
    %48 = vector.broadcast %31 : vector<1x128xf32> to vector<16x128xf32>
    %49 = vector.broadcast %47 : vector<16x1xf32> to vector<16x128xf32>
    %50 = arith.cmpf oeq, %48, %49 : vector<16x128xf32>
    %cst_23 = arith.constant -1.000000e+00 : f32
    %51 = vector.broadcast %cst_23 : f32 to vector<16x128xf32>
    %52 = arith.select %50, %51, %37 : vector<16x128xi1>, vector<16x128xf32>
    %cst_24 = arith.constant dense<0xFF800000> : vector<16xf32>
    %53 = vector.multi_reduction <maximumf>, %52, %cst_24 [1] : vector<16x128xf32> to vector<16xf32>
    %54 = vector.shape_cast %53 : vector<16xf32> to vector<16x1xf32>
    %55 = vector.broadcast %54 : vector<16x1xf32> to vector<16x128xf32>
    %56 = arith.cmpf oeq, %52, %55 : vector<16x128xf32>
    %cst_25 = arith.constant 1.280000e+02 : f32
    %57 = vector.shape_cast %31 : vector<1x128xf32> to vector<1x128xf32>
    %58 = vector.broadcast %57 : vector<1x128xf32> to vector<16x128xf32>
    %59 = vector.broadcast %cst_25 : f32 to vector<16x128xf32>
    %60 = arith.select %56, %58, %59 : vector<16x128xi1>, vector<16x128xf32>
    %cst_26 = arith.constant dense<0x7F800000> : vector<16xf32>
    %61 = vector.multi_reduction <minimumf>, %60, %cst_26 [1] : vector<16x128xf32> to vector<16xf32>
    %62 = vector.shape_cast %61 : vector<16xf32> to vector<16x1xf32>
    %63 = vector.broadcast %31 : vector<1x128xf32> to vector<16x128xf32>
    %64 = vector.broadcast %62 : vector<16x1xf32> to vector<16x128xf32>
    %65 = arith.cmpf oeq, %63, %64 : vector<16x128xf32>
    %cst_27 = arith.constant -1.000000e+00 : f32
    %66 = vector.broadcast %cst_27 : f32 to vector<16x128xf32>
    %67 = arith.select %65, %66, %52 : vector<16x128xi1>, vector<16x128xf32>
    %cst_28 = arith.constant dense<0xFF800000> : vector<16xf32>
    %68 = vector.multi_reduction <maximumf>, %67, %cst_28 [1] : vector<16x128xf32> to vector<16xf32>
    %69 = vector.shape_cast %68 : vector<16xf32> to vector<16x1xf32>
    %70 = vector.broadcast %69 : vector<16x1xf32> to vector<16x128xf32>
    %71 = arith.cmpf oeq, %67, %70 : vector<16x128xf32>
    %cst_29 = arith.constant 1.280000e+02 : f32
    %72 = vector.shape_cast %31 : vector<1x128xf32> to vector<1x128xf32>
    %73 = vector.broadcast %72 : vector<1x128xf32> to vector<16x128xf32>
    %74 = vector.broadcast %cst_29 : f32 to vector<16x128xf32>
    %75 = arith.select %71, %73, %74 : vector<16x128xi1>, vector<16x128xf32>
    %cst_30 = arith.constant dense<0x7F800000> : vector<16xf32>
    %76 = vector.multi_reduction <minimumf>, %75, %cst_30 [1] : vector<16x128xf32> to vector<16xf32>
    %77 = vector.shape_cast %76 : vector<16xf32> to vector<16x1xf32>
    %78 = vector.broadcast %31 : vector<1x128xf32> to vector<16x128xf32>
    %79 = vector.broadcast %77 : vector<16x1xf32> to vector<16x128xf32>
    %80 = arith.cmpf oeq, %78, %79 : vector<16x128xf32>
    %cst_31 = arith.constant -1.000000e+00 : f32
    %81 = vector.broadcast %cst_31 : f32 to vector<16x128xf32>
    %82 = arith.select %80, %81, %67 : vector<16x128xi1>, vector<16x128xf32>
    %cst_32 = arith.constant dense<0xFF800000> : vector<16xf32>
    %83 = vector.multi_reduction <maximumf>, %82, %cst_32 [1] : vector<16x128xf32> to vector<16xf32>
    %84 = vector.shape_cast %83 : vector<16xf32> to vector<16x1xf32>
    %85 = vector.broadcast %84 : vector<16x1xf32> to vector<16x128xf32>
    %86 = arith.cmpf oeq, %82, %85 : vector<16x128xf32>
    %cst_33 = arith.constant 1.280000e+02 : f32
    %87 = vector.shape_cast %31 : vector<1x128xf32> to vector<1x128xf32>
    %88 = vector.broadcast %87 : vector<1x128xf32> to vector<16x128xf32>
    %89 = vector.broadcast %cst_33 : f32 to vector<16x128xf32>
    %90 = arith.select %86, %88, %89 : vector<16x128xi1>, vector<16x128xf32>
    %cst_34 = arith.constant dense<0x7F800000> : vector<16xf32>
    %91 = vector.multi_reduction <minimumf>, %90, %cst_34 [1] : vector<16x128xf32> to vector<16xf32>
    %92 = vector.shape_cast %91 : vector<16xf32> to vector<16x1xf32>
    %93 = vector.broadcast %31 : vector<1x128xf32> to vector<16x128xf32>
    %94 = vector.broadcast %92 : vector<16x1xf32> to vector<16x128xf32>
    %95 = arith.cmpf oeq, %93, %94 : vector<16x128xf32>
    %cst_35 = arith.constant -1.000000e+00 : f32
    %96 = vector.broadcast %cst_35 : f32 to vector<16x128xf32>
    %97 = arith.select %95, %96, %82 : vector<16x128xi1>, vector<16x128xf32>
    %cst_36 = arith.constant 0.000000e+00 : f32
    %98 = vector.broadcast %cst_36 : f32 to vector<16x128xf32>
    %99 = arith.cmpf olt, %97, %98 : vector<16x128xf32>
    %100 = vector.broadcast %33 : vector<1x128xi1> to vector<16x128xi1>
    %101 = arith.andi %99, %100 : vector<16x128xi1>
    %cst_37 = arith.constant 0.000000e+00 : f32
    %102 = vector.broadcast %cst_37 : f32 to vector<16x128xf32>
    %103 = arith.select %101, %29, %102 : vector<16x128xi1>, vector<16x128xf32>
    %c0_38 = arith.constant 0 : index
    %c0_39 = arith.constant 0 : index
    %104 = vector.load %arg6[%c0_38, %c0_39] : memref<16x128xf32, #tpu.memory_space<vmem>>, vector<16x128xf32>
    tpu.vector_store %arg6[%c0_38, %c0_39], %103 {strides = array<i32>} : memref<16x128xf32, #tpu.memory_space<vmem>>, vector<16x128xf32>,
    return
  }
}

</mosaic_0001>

<bundles_post_ra>
// kernel: forward.1
= control target key start
LH: loop header
LB: loop body
LE: loop exit
PB: predicated region body
PF: predicated region fallthrough
CT: control target
= control target key end

     0   :  { %s4057_s0 = inlined_call_operand.vmem [shape: f32[16,128], index: 0, kind: input, shape index: {}]   ;;  %s4058_s1 = inlined_call_operand.vmem [shape: f32[16,128], index: 1, kind: input, shape index: {}]   ;;  %s4059_s2 = inlined_call_operand.vmem [shape: f32[128,128], index: 2, kind: input, shape index: {}]   ;;  %s4060_s3 = inlined_call_operand.vmem [shape: f32[1,128], index: 3, kind: input, shape index: {}]   ;;  %s4061_s4 = inlined_call_operand.vmem [shape: f32[128,128], index: 4, kind: input, shape index: {}]   ;;  %s4062_s5 = inlined_call_operand.vmem [shape: f32[1,128], index: 5, kind: input, shape index: {}]   ;;  %s4063_s6 = inlined_call_operand.hbm [shape: f32[16,128], index: 6, kind: output, shape index: {}]  }
   0x1   :  { %v26_v0 = vld [vmem:[%s4059_s2] sm:$0xff]  ;;  %v27_v1 = vld [vmem:[%s4059_s2 + $0x8] sm:$0xff]  ;;  %v28_v2 = vld [vmem:[%s4059_s2 + $0x10] sm:$0xff] }
   0x2   :  { %v50_v3 = vand.u32 4294901760, %v26_v0  ;;  %v53_v4 = vand.u32 4294901760, %v27_v1  ;;  %v29_v5 = vld [vmem:[%s4059_s2 + $0x18] sm:$0xff]  ;;  %v56_v6 = vand.u32 4294901760, %v28_v2  ;;  %v30_v7 = vld [vmem:[%s4059_s2 + $0x20] sm:$0xff]  ;;  %v31_v8 = vld [vmem:[%s4059_s2 + $0x28] sm:$0xff] }
   0x3   :  { %v59_v9 = vand.u32 4294901760, %v29_v5  ;;  %v62_v10 = vand.u32 4294901760, %v30_v7  ;;  %v65_v11 = vand.u32 4294901760, %v31_v8  ;;  %v32_v12 = vld [vmem:[%s4059_s2 + $0x30] sm:$0xff]  ;;  %v33_v13 = vld [vmem:[%s4059_s2 + $0x38] sm:$0xff]  ;;  %v34_v18 = vld [vmem:[%s4059_s2 + $0x40] sm:$0xff] }
   0x4   :  { %v3299_v14 = vpack.c.bf16 %v53_v4, %v50_v3  ;;  %v3301_v15 = vsub.f32 %v26_v0, %v50_v3  ;;  %v3303_v16 = vsub.f32 %v27_v1, %v53_v4  ;;  %v68_v17 = vand.u32 4294901760, %v32_v12  ;;  %v35_v26 = vld [vmem:[%s4059_s2 + $0x48] sm:$0xff]  ;;  %v36_v27 = vld [vmem:[%s4059_s2 + $0x50] sm:$0xff]  ;;  %v37_v36 = vld [vmem:[%s4059_s2 + $0x58] sm:$0xff] }
   0x5   :  { %v3308_v19 = vpack.c.bf16 %v59_v9, %v56_v6  ;;  %v71_v20 = vand.u32 4294901760, %v33_v13  ;;  %v3310_v21 = vsub.f32 %v28_v2, %v56_v6  ;;  %v3313_v22 = vpack.c.bf16 %v65_v11, %v62_v10  ;;  %v38_v53 = vld [vmem:[%s4059_s2 + $0x60] sm:$0xff]  ;;  %v39_v57 = vld [vmem:[%s4059_s2 + $0x68] sm:$0xff]  ;;  %v3376_v58 = vld [vmem:[%s4059_s2 + $0x70] sm:$0xff] }
   0x6   :  { %4124 = vst [vmem:[#allocation5_spill] sm:$0xff] %v3299_v14  ;;  %2747 = vmatprep.subr.bf16.mxu1 %v3299_v14  ;;  %v4082_v23 = vand.u32 4294901760, %v3301_v15  ;;  %v4081_v24 = vand.u32 4294901760, %v3303_v16  ;;  %v3317_v25 = vsub.f32 %v29_v5, %v59_v9  ;;  %v74_v30 = vand.u32 4294901760, %v34_v18 }
   0x7   :  { %4125 = vst [vmem:[#allocation6_spill] sm:$0xff] %v3308_v19  ;;  %4126 = vst [vmem:[#allocation7_spill] sm:$0xff] %v3313_v22  ;;  %2749 = vmatpush3.bf16.msra.mxu1 %v3299_v14  ;;  %v3326_v28 = vpack.c.bf16 %v71_v20, %v68_v17  ;;  %v4080_v29 = vand.u32 4294901760, %v3310_v21  ;;  %v3329_v31 = vsub.f32 %v30_v7, %v62_v10  ;;  %v77_v38 = vand.u32 4294901760, %v35_v26 }
   0x8   :  { %2751 = vmatprep.subr.bf16.mxu1 %v3308_v19  ;;  %v154_v32 = vsub.f32 %v3301_v15, %v4082_v23  ;;  %v161_v33 = vsub.f32 %v3303_v16, %v4081_v24  ;;  %v4078_v34 = vand.u32 4294901760, %v3317_v25  ;;  %v3339_v35 = vsub.f32 %v31_v8, %v65_v11 }
   0x9   :  { %4127 = vst [vmem:[#allocation8_spill] sm:$0xff] %v3326_v28  ;;  %v168_v37 = vsub.f32 %v3310_v21, %v4080_v29  ;;  %v4077_v39 = vand.u32 4294901760, %v3329_v31  ;;  %v80_v40 = vand.u32 4294901760, %v36_v27  ;;  %v83_v47 = vand.u32 4294901760, %v37_v36 }
   0xa   :  { %v155_v41 = vand.u32 4294901760, %v154_v32  ;;  %v162_v42 = vand.u32 4294901760, %v161_v33  ;;  %v175_v43 = vsub.f32 %v3317_v25, %v4078_v34  ;;  %v4076_v44 = vand.u32 4294901760, %v3339_v35 }
   0xb   :  { %2753 = vmatpush3.bf16.msra.mxu1 %v3308_v19  ;;  %v169_v45 = vand.u32 4294901760, %v168_v37  ;;  %v182_v46 = vsub.f32 %v3329_v31, %v4077_v39  ;;  %v3356_v48 = vsub.f32 %v32_v12, %v68_v17  ;;  %v3362_v52 = vsub.f32 %v33_v13, %v71_v20 }
   0xc   :  { %2755 = vmatprep.subr.bf16.mxu1 %v3313_v22  ;;  %v2778_v49 = vpack.c.bf16 %v162_v42, %v155_v41  ;;  %v176_v50 = vand.u32 4294901760, %v175_v43  ;;  %v189_v51 = vsub.f32 %v3339_v35, %v4076_v44  ;;  %v3367_v54 = vpack.c.bf16 %v77_v38, %v74_v30 }
   0xd   :  { %v183_v55 = vand.u32 4294901760, %v182_v46  ;;  %v4075_v56 = vand.u32 4294901760, %v3356_v48 }
   0xe   :  { %4128 = vst [vmem:[#allocation9_spill] sm:$0xff] %v3367_v54 }
   0xf   :  { %11 = vsyncpa [#allocation3], 0  ;;  %2779 = vmatprep.subr.bf16.mxu0 %v2778_v49  ;;  %v2782_v59 = vpack.c.bf16 %v176_v50, %v169_v45  ;;  %v190_v60 = vand.u32 4294901760, %v189_v51  ;;  %v3378_v61 = vpack.c.bf16 %v83_v47, %v80_v40  ;;  %v4074_v62 = vand.u32 4294901760, %v3362_v52  ;;  %2757 = vmatpush3.bf16.msra.mxu1 %v3313_v22  ;;  %v3392_v3 = vld [vmem:[%s4059_s2 + $0x78] sm:$0xff]  ;;  %v24_v4 = vld [vmem:[%s4057_s0] sm:$0xff] }
  0x10   :  { %2781 = vmatpush3.bf16.msra.mxu0 %v2778_v49  ;;  %v196_v63 = vsub.f32 %v3356_v48, %v4075_v56  ;;  %v86_v0 = vand.u32 4294901760, %v38_v53  ;;  %v3385_v1 = vsub.f32 %v34_v18, %v74_v30  ;;  %v3387_v2 = vsub.f32 %v35_v26, %v77_v38  ;;  %2759 = vmatprep.subr.bf16.mxu1 %v3326_v28  ;;  %v25_v9 = vld [vmem:[%s4057_s0 + $0x8] sm:$0xff]  ;;  %v751_v24 = vld [vmem:[%s4061_s4 + $0x60] sm:$0xff] }
  0x11   :  { %4129 = vst [vmem:[#allocation10_spill] sm:$0xff] %v3378_v61  ;;  %2783 = vmatprep.subr.bf16.mxu0 %v2782_v59  ;;  %v2786_v5 = vpack.c.bf16 %v190_v60, %v183_v55  ;;  %v203_v6 = vsub.f32 %v3362_v52, %v4074_v62  ;;  %v89_v7 = vand.u32 4294901760, %v39_v57  ;;  %v92_v8 = vand.u32 4294901760, %v3376_v58  ;;  %v752_v23 = vld [vmem:[%s4061_s4 + $0x68] sm:$0xff] }
  0x12   :  { %v197_v10 = vand.u32 4294901760, %v196_v63  ;;  %v4073_v11 = vand.u32 4294901760, %v3385_v1  ;;  %v4072_v12 = vand.u32 4294901760, %v3387_v2  ;;  %v3407_v13 = vsub.f32 %v36_v27, %v80_v40 }
  0x13   :  { %v204_v17 = vand.u32 4294901760, %v203_v6  ;;  %v95_v18 = vand.u32 4294901760, %v3392_v3  ;;  %v3410_v20 = vsub.f32 %v37_v36, %v83_v47  ;;  %v3412_v26 = vand.u32 4294901760, %v24_v4  ;;  %2761 = vmatpush3.bf16.msra.mxu1 %v3326_v28 }
  0x14   :  { %2785 = vmatpush3.bf16.msra.mxu0 %v2782_v59  ;;  %v210_v30 = vsub.f32 %v3385_v1, %v4073_v11  ;;  %v217_v32 = vsub.f32 %v3387_v2, %v4072_v12  ;;  %v4071_v27 = vand.u32 4294901760, %v3407_v13  ;;  %v3422_v33 = vand.u32 4294901760, %v25_v9  ;;  %2763 = vmatprep.subr.bf16.mxu1 %v3367_v54 }
  0x15   :  { %4130 = vst [vmem:[#allocation11_spill] sm:$0xff] %v3412_v26  ;;  %2787 = vmatprep.subr.bf16.mxu0 %v2786_v5  ;;  %v2790_v36 = vpack.c.bf16 %v204_v17, %v197_v10  ;;  %v4070_v37 = vand.u32 4294901760, %v3410_v20  ;;  %v3427_v38 = vsub.f32 %v24_v4, %v3412_v26  ;;  %v3429_v40 = vsub.f32 %v38_v53, %v86_v0  ;;  %v3464_v4 = vld [vmem:[%s4061_s4 + $0x8] sm:$0xff] }
  0x16   :  { %4131 = vst [vmem:[#allocation12_spill] sm:$0xff] %v3422_v33  ;;  %v211_v41 = vand.u32 4294901760, %v210_v30  ;;  %v218_v42 = vand.u32 4294901760, %v217_v32  ;;  %v224_v43 = vsub.f32 %v3407_v13, %v4071_v27  ;;  %v3435_v45 = vsub.f32 %v25_v9, %v3422_v33  ;;  %2393 = vmatprep.mubr.f32.mxu0 %v3412_v26  ;;  %v3555_v27 = vld [vmem:[%s4061_s4 + $0x48] sm:$0xff] }
  0x17   :  { %4132 = vst [vmem:[#allocation13_spill] sm:$0xff] %v3427_v38  ;;  %v231_v46 = vsub.f32 %v3410_v20, %v4070_v37  ;;  %v4064_v47 = vand.u32 4294901760, %v3427_v38  ;;  %v4069_v49 = vand.u32 4294901760, %v3429_v40  ;;  %v3443_v50 = vsub.f32 %v39_v57, %v89_v7  ;;  %2765 = vmatpush3.bf16.msra.mxu1 %v3367_v54 }
  0x18   :  { %4133 = vst [vmem:[#allocation14_spill] sm:$0xff] %v3435_v45  ;;  %2789 = vmatpush3.bf16.msra.mxu0 %v2786_v5  ;;  %v3446_v51 = vpack.c.bf16 %v89_v7, %v86_v0  ;;  %v2794_v53 = vpack.c.bf16 %v218_v42, %v211_v41  ;;  %v225_v55 = vand.u32 4294901760, %v224_v43  ;;  %2767 = vmatprep.subr.bf16.mxu1 %v3378_v61  ;;  %v3459_v0 = vld [vmem:[%s4061_s4] sm:$0xff]  ;;  %v4066_v9 = vand.u32 4294901760, %v3435_v45 }
  0x19   :  { %2791 = vmatprep.subr.bf16.mxu0 %v2790_v36  ;;  %v232_v59 = vand.u32 4294901760, %v231_v46  ;;  %v133_v60 = vsub.f32 %v3427_v38, %v4064_v47  ;;  %v238_v57 = vsub.f32 %v3429_v40, %v4069_v49  ;;  %v4068_v63 = vand.u32 4294901760, %v3443_v50  ;;  %v3526_v49 = vld [vmem:[%s4061_s4 + $0x30] sm:$0xff] }
  0x1a   :  { %4134 = vst [vmem:[#allocation15_spill] sm:$0xff] %v3446_v51  ;;  %v3467_v5 = vsub.f32 %v3376_v58, %v92_v8  ;;  %v3470_v6 = vsub.f32 %v3392_v3, %v95_v18  ;;  %v763_v17 = vand.u32 4294901760, %v3459_v0  ;;  %v766_v30 = vand.u32 4294901760, %v3464_v4 }
  0x1b   :  { %v134_v7 = vand.u32 4294901760, %v133_v60  ;;  %v245_v10 = vsub.f32 %v3443_v50, %v4068_v63  ;;  %2769 = vmatpush3.bf16.msra.mxu1 %v3378_v61  ;;  %v3482_v3 = vpack.c.bf16 %v95_v18, %v92_v8  ;;  %v2798_v41 = vpack.c.bf16 %v232_v59, %v225_v55  ;;  %v742_v8 = vld [vmem:[%s4061_s4 + $0x18] sm:$0xff] }
  0x1c   :  { %2793 = vmatpush3.bf16.msra.mxu0 %v2790_v36  ;;  %v4067_v58 = vand.u32 4294901760, %v3467_v5  ;;  %v4065_v32 = vand.u32 4294901760, %v3470_v6  ;;  %2771 = vmatprep.subr.bf16.mxu1 %v3446_v51  ;;  %v239_v42 = vand.u32 4294901760, %v238_v57  ;;  %v741_v36 = vld [vmem:[%s4061_s4 + $0x10] sm:$0xff]  ;;  %v143_v18 = vsub.f32 %v3435_v45, %v4066_v9  ;;  %v737_v9 = vld [vmem:[%s4058_s1] sm:$0xff] }
  0x1d   :  { %2795 = vmatprep.subr.bf16.mxu0 %v2794_v53  ;;  %4135 = vst [vmem:[#allocation16_spill] sm:$0xff] %v3482_v3  ;;  %v246_v43 = vand.u32 4294901760, %v245_v10  ;;  %2358 = vmatprep.mubr.f32.mxu1 %v134_v7  ;;  %v3502_v55 = vpack.c.bf16 %v766_v30, %v763_v17  ;;  %v769_v59 = vand.u32 4294901760, %v741_v36  ;;  %v772_v47 = vand.u32 4294901760, %v742_v8 }
  0x1e   :  { %v252_v46 = vsub.f32 %v3467_v5, %v4067_v58  ;;  %v259_v60 = vsub.f32 %v3470_v6, %v4065_v32  ;;  %v743_v32 = vld [vmem:[%s4061_s4 + $0x20] sm:$0xff]  ;;  %v144_v58 = vand.u32 4294901760, %v143_v18  ;;  %v3521_v63 = vand.u32 4294901760, %v737_v9 }
  0x1f   :  { %2773 = vmatpush3.bf16.msra.mxu1 %v3446_v51  ;;  %4136 = vst [vmem:[#allocation17_spill] sm:$0xff] %v3502_v55  ;;  %v2802_v57 = vpack.c.bf16 %v246_v43, %v239_v42  ;;  %v775_v42 = vand.u32 4294901760, %v743_v32  ;;  %v3567_v39 = vsub.f32 %v3459_v0, %v763_v17  ;;  %v2814_v34 = vpack.c.bf16 %v3317_v25, %v3310_v21  ;;  %v750_v0 = vld [vmem:[%s4061_s4 + $0x58] sm:$0xff] }
  0x20   :  { %2797 = vmatpush3.bf16.msra.mxu0 %v2794_v53  ;;  %2775 = vmatprep.subr.bf16.mxu1 %v3482_v3  ;;  %v253_v7 = vand.u32 4294901760, %v252_v46  ;;  %v260_v10 = vand.u32 4294901760, %v259_v60  ;;  %v3511_v53 = vld [vmem:[%s4061_s4 + $0x28] sm:$0xff]  ;;  %v3518_v46 = vpack.c.bf16 %v772_v47, %v769_v59  ;;  %v3534_v18 = vsub.f32 %v737_v9, %v3521_v63 }
  0x21   :  { %2799 = vmatprep.subr.bf16.mxu0 %v2798_v41  ;;  %v778_v60 = vand.u32 4294901760, %v3511_v53  ;;  %v3587_v29 = vsub.f32 %v3464_v4, %v766_v30  ;;  %v753_v4 = vld [vmem:[%s4061_s4 + $0x70] sm:$0xff]  ;;  %v754_v30 = vld [vmem:[%s4061_s4 + $0x78] sm:$0xff]  ;;  %v2826_v26 = vpack.c.bf16 %v3387_v2, %v3385_v1  ;;  %v4149_v22 = vand.u32 4294901760, %v3526_v49 }
  0x22   :  { %v2806_v43 = vpack.c.bf16 %v260_v10, %v253_v7  ;;  %4137 = vst [vmem:[#allocation18_spill] sm:$0xff] %v3518_v46  ;;  %4138 = vst [vmem:[#allocation19_spill] sm:$0xff] %v3534_v18  ;;  %v2810_v7 = vpack.c.bf16 %v3303_v16, %v3301_v15  ;;  %v738_v10 = vld [vmem:[%s4058_s1 + $0x8] sm:$0xff]  ;;  %v4079_v12 = vand.u32 4294901760, %v3534_v18 }
  0x23   :  { %2777 = vmatpush3.bf16.msra.mxu1 %v3482_v3  ;;  %v3543_v37 = vpack.c.bf16 %v778_v60, %v775_v42  ;;  %v3561_v62 = vand.u32 4294901760, %v738_v10 }
  0x24   :  { %2801 = vmatpush3.bf16.msra.mxu0 %v2798_v41  ;;  %2939 = vmatprep.subr.bf16.mxu1 %v3502_v55  ;;  %v3531_v41 = vld [vmem:[%s4061_s4 + $0x38] sm:$0xff]  ;;  %v846_v11 = vsub.f32 %v3534_v18, %v4079_v12  ;;  %v749_v12 = vld [vmem:[%s4061_s4 + $0x50] sm:$0xff] }
  0x25   :  { %2803 = vmatprep.subr.bf16.mxu0 %v2802_v57  ;;  %4139 = vst [vmem:[#allocation20_spill] sm:$0xff] %v3543_v37  ;;  %v4083_v9 = vand.u32 4294901760, %v3531_v41  ;;  %4140 = vst [vmem:[#allocation21_spill] sm:$0xff] %v3561_v62  ;;  %v3609_v44 = vsub.f32 %v738_v10, %v3561_v62  ;;  %v4151_v14 = vand.u32 4294901760, %v3531_v41 }
  0x26   :  { %2359 = vmatmul.mubr.f32.vlgmr.msra.gmra.mrb[0].mxu1 %v144_v58  ;;  %v4084_v58 = vand.u32 4294901760, %v3526_v49  ;;  %v847_v17 = vand.u32 4294901760, %v846_v11  ;;  %v2818_v11 = vpack.c.bf16 %v3339_v35, %v3329_v31 }
  0x27   :  { %2941 = vmatpush3.bf16.msra.mxu1 %v3502_v55  ;;  %4143 = vst [vmem:[#allocation24_spill] sm:$0xff] %v3609_v44  ;;  %v802_v55 = vand.u32 4294901760, %v752_v23  ;;  %v4150_v19 = vand.u32 4294901760, %v3609_v44 }
  0x28   :  { %2805 = vmatpush3.bf16.msra.mxu0 %v2802_v57  ;;  %2943 = vmatprep.subr.bf16.mxu1 %v3518_v46  ;;  %v3550_v57 = vld [vmem:[%s4061_s4 + $0x40] sm:$0xff] }
  0x29   :  { %2807 = vmatprep.subr.bf16.mxu0 %v2806_v43  ;;  %v787_v56 = vand.u32 4294901760, %v3550_v57  ;;  %2568 = vmatprep.mubr.f32.mxu1 %v847_v17  ;;  %v799_v17 = vand.u32 4294901760, %v751_v24 }
  0x2b   :  { %2945 = vmatpush3.bf16.msra.mxu1 %v3518_v46  ;;  %v2822_v46 = vpack.c.bf16 %v3362_v52, %v3356_v48  ;;  %v3646_v18 = vpack.c.bf16 %v802_v55, %v799_v17 }
  0x2c   :  { %2809 = vmatpush3.bf16.msra.mxu0 %v2806_v43  ;;  %2947 = vmatprep.subr.bf16.mxu1 %v3543_v37  ;;  %v3576_v43 = vpack.c.bf16 %v4083_v9, %v4084_v58  ;;  %v3595_v9 = vsub.f32 %v741_v36, %v769_v59  ;;  %v3597_v58 = vsub.f32 %v742_v8, %v772_v47  ;;  %v4145_v47 = vand.u32 4294901760, %v3555_v27 }
  0x2d   :  { %2811 = vmatprep.subr.bf16.mxu0 %v2810_v7  ;;  %v3611_v36 = vsub.f32 %v743_v32, %v775_v42  ;;  %v793_v59 = vand.u32 4294901760, %v749_v12  ;;  %v3622_v32 = vsub.f32 %v3511_v53, %v778_v60  ;;  %v805_v42 = vand.u32 4294901760, %v753_v4 }
  0x2e   :  { %4141 = vst [vmem:[#allocation22_spill] sm:$0xff] %v3576_v43  ;;  %4142 = vst [vmem:[#allocation23_spill] sm:$0xff] %v3597_v58  ;;  %v3616_v8 = vpack.c.bf16 %v4145_v47, %v787_v56  ;;  %v887_v47 = vand.u32 4294901760, %v3597_v58  ;;  %v3638_v60 = vpack.c.bf16 %v3410_v20, %v3407_v13 }
  0x2f   :  { %2394 = vmatmul.mubr.f32.vlgmr.msra.gmra.mrb[0].mxu0 %v3422_v33  ;;  %4144 = vst [vmem:[#allocation25_spill] sm:$0xff] %v3611_v36  ;;  %2949 = vmatpush3.bf16.msra.mxu1 %v3543_v37  ;;  %v796_v33 = vand.u32 4294901760, %v750_v0  ;;  %v894_v10 = vand.u32 4294901760, %v3611_v36  ;;  %v4146_v37 = vand.u32 4294901760, %v3567_v39  ;;  %v901_v51 = vand.u32 4294901760, %v3622_v32 }
  0x30   :  { %2813 = vmatpush3.bf16.msra.mxu0 %v2810_v7  ;;  %2951 = vmatprep.subr.bf16.mxu1 %v3576_v43  ;;  %v808_v7 = vand.u32 4294901760, %v754_v30  ;;  %v3664_v28 = vsub.f32 %v3597_v58, %v887_v47  ;;  %v3685_v58 = vsub.f32 %v3550_v57, %v787_v56  ;;  %v3702_v57 = vsub.f32 %v752_v23, %v802_v55 }
  0x31   :  { %2815 = vmatprep.subr.bf16.mxu0 %v2814_v34  ;;  %2428 = vmatprep.mubr.f32.mxu0 %v3427_v38  ;;  %v3634_v53 = vpack.c.bf16 %v796_v33, %v793_v59  ;;  %v3643_v3 = vsub.f32 %v3567_v39, %v4146_v37  ;;  %v4148_v37 = vand.u32 4294901760, %v3595_v9  ;;  %v3669_v38 = vsub.f32 %v3526_v49, %v4149_v22 }
  0x32   :  { %v3656_v61 = vpack.c.bf16 %v808_v7, %v805_v42  ;;  %v3677_v45 = vsub.f32 %v3611_v36, %v894_v10  ;;  %v4152_v49 = vand.u32 4294901760, %v3555_v27  ;;  %v3696_v36 = vsub.f32 %v750_v0, %v796_v33 }
  0x33   :  { %2953 = vmatpush3.bf16.msra.mxu1 %v3576_v43  ;;  %v4147_v43 = vand.u32 4294901760, %v3587_v29  ;;  %v3661_v54 = vsub.f32 %v3595_v9, %v4148_v37  ;;  %v3682_v37 = vsub.f32 %v3531_v41, %v4151_v14  ;;  %v868_v22 = vand.u32 4294901760, %v3643_v3 }
  0x34   :  { %2817 = vmatpush3.bf16.msra.mxu0 %v2814_v34  ;;  %2955 = vmatprep.subr.bf16.mxu1 %v3616_v8  ;;  %v3650_v34 = vpack.c.bf16 %v3443_v50, %v3429_v40  ;;  %v902_v56 = vsub.f32 %v3622_v32, %v901_v51  ;;  %v3700_v41 = vsub.f32 %v751_v24, %v799_v17  ;;  %v908_v3 = vand.u32 4294901760, %v3669_v38 }
  0x35   :  { %2819 = vmatprep.subr.bf16.mxu0 %v2818_v11  ;;  %v874_v62 = vsub.f32 %v3587_v29, %v4147_v43  ;;  %v3674_v43 = vsub.f32 %v3609_v44, %v4150_v19  ;;  %v3692_v19 = vsub.f32 %v3555_v27, %v4152_v49  ;;  %v3694_v44 = vsub.f32 %v749_v12, %v793_v59 }
  0x36   :  { %v4153_v27 = vand.u32 4294901760, %v3301_v15  ;;  %v4154_v12 = vand.u32 4294901760, %v3303_v16  ;;  %v4155_v0 = vand.u32 4294901760, %v3310_v21  ;;  %v915_v24 = vand.u32 4294901760, %v3682_v37 }
  0x37   :  { %2957 = vmatpush3.bf16.msra.mxu1 %v3616_v8  ;;  %v875_v14 = vand.u32 4294901760, %v874_v62  ;;  %v4156_v62 = vand.u32 4294901760, %v3317_v25  ;;  %v922_v23 = vand.u32 4294901760, %v3685_v58  ;;  %v3721_v55 = vsub.f32 %v754_v30, %v808_v7 }
  0x38   :  { %2821 = vmatpush3.bf16.msra.mxu0 %v2818_v11  ;;  %2959 = vmatprep.subr.bf16.mxu1 %v3634_v53  ;;  %v3705_v11 = vsub.f32 %v753_v4, %v805_v42  ;;  %v3711_v33 = vpack.c.bf16 %v4154_v12, %v4153_v27  ;;  %v4157_v4 = vand.u32 4294901760, %v3329_v31  ;;  %v4158_v15 = vand.u32 4294901760, %v3339_v35 }
  0x39   :  { %2823 = vmatprep.subr.bf16.mxu0 %v2822_v46  ;;  %v3717_v59 = vpack.c.bf16 %v4156_v62, %v4155_v0  ;;  %v929_v16 = vand.u32 4294901760, %v3692_v19  ;;  %v936_v21 = vand.u32 4294901760, %v3694_v44  ;;  %v943_v25 = vand.u32 4294901760, %v3696_v36 }
  0x3a   :  { %v3727_v17 = vpack.c.bf16 %v4158_v15, %v4157_v4  ;;  %v4159_v42 = vand.u32 4294901760, %v3356_v48  ;;  %v4160_v30 = vand.u32 4294901760, %v3362_v52  ;;  %v950_v31 = vand.u32 4294901760, %v3700_v41 }
  0x3b   :  { %2961 = vmatpush3.bf16.msra.mxu1 %v3634_v53  ;;  %v957_v35 = vand.u32 4294901760, %v3702_v57  ;;  %v4162_v49 = vand.u32 4294901760, %v3387_v2  ;;  %v4163_v12 = vand.u32 4294901760, %v3407_v13  ;;  %v4164_v48 = vand.u32 4294901760, %v3410_v20 }
  0x3c   :  { %2825 = vmatpush3.bf16.msra.mxu0 %v2822_v46  ;;  %v3737_v7 = vpack.c.bf16 %v4160_v30, %v4159_v42  ;;  %2963 = vmatprep.subr.bf16.mxu1 %v3646_v18  ;;  %v4161_v46 = vand.u32 4294901760, %v3385_v1  ;;  %v964_v0 = vand.u32 4294901760, %v3705_v11  ;;  %v4165_v62 = vand.u32 4294901760, %v3429_v40 }
  0x3d   :  { %2827 = vmatprep.subr.bf16.mxu0 %v2826_v26  ;;  %v3752_v52 = vpack.c.bf16 %v4164_v48, %v4163_v12  ;;  %v4166_v4 = vand.u32 4294901760, %v3443_v50  ;;  %v4167_v1 = vand.u32 4294901760, %v3467_v5  ;;  %v4168_v2 = vand.u32 4294901760, %v3470_v6 }
  0x3e   :  { %v3746_v27 = vpack.c.bf16 %v4162_v49, %v4161_v46  ;;  %v4169_v13 = vand.u32 4294901760, %v3567_v39  ;;  %v4170_v20 = vand.u32 4294901760, %v3587_v29  ;;  %v971_v46 = vand.u32 4294901760, %v3721_v55 }
  0x3f   :  { %v3759_v15 = vpack.c.bf16 %v4166_v4, %v4165_v62  ;;  %v3765_v42 = vpack.c.bf16 %v4168_v2, %v4167_v1  ;;  %v4171_v40 = vand.u32 4294901760, %v3595_v9  ;;  %v3778_v50 = vpack.c.bf16 %v901_v51, %v894_v10  ;;  %2965 = vmatpush3.bf16.msra.mxu1 %v3646_v18 }
  0x40   :  { %v3771_v30 = vpack.c.bf16 %v4170_v20, %v4169_v13  ;;  %v3780_v12 = vpack.c.bf16 %v915_v24, %v908_v3  ;;  %2829 = vmatpush3.bf16.msra.mxu0 %v2826_v26  ;;  %v3783_v48 = vpack.c.bf16 %v929_v16, %v922_v23  ;;  %v3785_v62 = vpack.c.bf16 %v943_v25, %v936_v21 }
  0x41   :  { %v3776_v49 = vpack.c.bf16 %v887_v47, %v4171_v40  ;;  %v3787_v4 = vpack.c.bf16 %v957_v35, %v950_v31  ;;  %2831 = vmatprep.subr.bf16.mxu0 %v3638_v60  ;;  %2967 = vmatprep.subr.bf16.mxu1 %v3656_v61  ;;  %v2970_v1 = vpack.c.bf16 %v875_v14, %v868_v22  ;;  %v882_v47 = vand.u32 4294901760, %v3661_v54 }
  0x42   :  { %v889_v51 = vand.u32 4294901760, %v3664_v28  ;;  %v3797_v26 = vpack.c.bf16 %v971_v46, %v964_v0  ;;  %v857_v10 = vand.u32 4294901760, %v3674_v43  ;;  %v2838_v2 = vpack.c.bf16 %v3470_v6, %v3467_v5 }
  0x43   :  { %2969 = vmatpush3.bf16.msra.mxu1 %v3656_v61  ;;  %v896_v22 = vand.u32 4294901760, %v3677_v45  ;;  %v903_v54 = vand.u32 4294901760, %v902_v56  ;;  %v909_v14 = vsub.f32 %v3669_v38, %v908_v3  ;;  %v916_v13 = vsub.f32 %v3682_v37, %v915_v24  ;;  %v4172_v3 = vld [vmem:[#allocation5_spill] sm:$0xff] }
  0x44   :  { %2833 = vmatpush3.bf16.msra.mxu0 %v3638_v60  ;;  %2971 = vmatprep.subr.bf16.mxu1 %v2970_v1  ;;  %v2974_v28 = vpack.c.bf16 %v889_v51, %v882_v47  ;;  %v923_v45 = vsub.f32 %v3685_v58, %v922_v23  ;;  %v930_v6 = vsub.f32 %v3692_v19, %v929_v16  ;;  %v4174_v16 = vld [vmem:[#allocation6_spill] sm:$0xff] }
  0x45   :  { %2835 = vmatprep.subr.bf16.mxu0 %v3650_v34  ;;  %v2978_v60 = vpack.c.bf16 %v903_v54, %v896_v22  ;;  %v910_v43 = vand.u32 4294901760, %v909_v14  ;;  %v917_v5 = vand.u32 4294901760, %v916_v13  ;;  %v937_v56 = vsub.f32 %v3694_v44, %v936_v21  ;;  %v4177_v54 = vld [vmem:[#allocation7_spill] sm:$0xff]  ;;  %v4178_v13 = vld [vmem:[#allocation8_spill] sm:$0xff] }
  0x46   :  { %2569 = vmatmul.mubr.f32.vlgmr.msra.gmra.mrb[2].mxu1 %v857_v10  ;;  %v924_v24 = vand.u32 4294901760, %v923_v45  ;;  %v931_v20 = vand.u32 4294901760, %v930_v6  ;;  %v944_v40 = vsub.f32 %v3696_v36, %v943_v25  ;;  %v951_v23 = vsub.f32 %v3700_v41, %v950_v31  ;;  %v4179_v45 = vld [vmem:[#allocation9_spill] sm:$0xff] }
  0x47   :  { %2973 = vmatpush3.bf16.msra.mxu1 %v2970_v1  ;;  %2603 = vmatprep.mubr.f32.mxu1 %v3521_v63  ;;  %v4173_v1 = vld [vmem:[#allocation14_spill] sm:$0xff]  ;;  %v938_v21 = vand.u32 4294901760, %v937_v56  ;;  %v958_v10 = vsub.f32 %v3702_v57, %v957_v35  ;;  %v965_v14 = vsub.f32 %v3705_v11, %v964_v0  ;;  %v972_v35 = vsub.f32 %v3721_v55, %v971_v46  ;;  %v4181_v56 = vld [vmem:[#allocation15_spill] sm:$0xff] }
  0x48   :  { %2837 = vmatpush3.bf16.msra.mxu0 %v3650_v34  ;;  %2975 = vmatprep.subr.bf16.mxu1 %v2974_v28  ;;  %v2982_v34 = vpack.c.bf16 %v917_v5, %v910_v43  ;;  %v2986_v47 = vpack.c.bf16 %v931_v20, %v924_v24  ;;  %v945_v51 = vand.u32 4294901760, %v944_v40  ;;  %v952_v25 = vand.u32 4294901760, %v951_v23  ;;  %v4180_v46 = vld [vmem:[#allocation10_spill] sm:$0xff]  ;;  %v4183_v20 = vld [vmem:[#allocation21_spill] sm:$0xff]  ;;  %v4184_v40 = vld [vmem:[#allocation16_spill] sm:$0xff] }
  0x49   :  { %2839 = vmatprep.subr.bf16.mxu0 %v2838_v2  ;;  %v959_v31 = vand.u32 4294901760, %v958_v10  ;;  %v966_v43 = vand.u32 4294901760, %v965_v14  ;;  %v973_v5 = vand.u32 4294901760, %v972_v35  ;;  %v3002_v6 = vpack.c.bf16 %v3587_v29, %v3567_v39  ;;  %v4185_v23 = vld [vmem:[#allocation25_spill] sm:$0xff]  ;;  %v4186_v39 = vld [vmem:[#allocation19_spill] sm:$0xff] }
  0x4a   :  { %v3010_v29 = vpack.c.bf16 %v3622_v32, %v4185_v23  ;;  %v3018_v32 = vpack.c.bf16 %v3692_v19, %v3685_v58  ;;  %v3026_v58 = vpack.c.bf16 %v3702_v57, %v3700_v41  ;;  %v4191_v19 = vld [vmem:[#allocation18_spill] sm:$0xff]  ;;  %v4192_v41 = vand.u32 4294901760, %v4186_v39  ;;  %v4193_v57 = vld [vmem:[#allocation20_spill] sm:$0xff] }
  0x4b   :  { %2977 = vmatpush3.bf16.msra.mxu1 %v2974_v28  ;;  %v2990_v28 = vpack.c.bf16 %v945_v51, %v938_v21  ;;  %v2998_v0 = vpack.c.bf16 %v973_v5, %v966_v43  ;;  %v4188_v21 = vld [vmem:[#allocation11_spill] sm:$0xff] }
  0x4c   :  { %2841 = vmatpush3.bf16.msra.mxu0 %v2838_v2  ;;  %2979 = vmatprep.subr.bf16.mxu1 %v2978_v60  ;;  %v4175_v2 = vld [vmem:[#allocation13_spill] sm:$0xff] }
  0x4d   :  { %2843 = vmatprep.subr.bf16.mxu0 %v4172_v3  ;;  %v4176_v22 = vand.u32 4294901760, %v4175_v2 }
  0x4f   :  { %2429 = vmatmul.mubr.f32.vlgmr.msra.gmra.mrb[0].mxu0 %v4173_v1  ;;  %2981 = vmatpush3.bf16.msra.mxu1 %v2978_v60  ;;  %v2994_v60 = vpack.c.bf16 %v959_v31, %v952_v25  ;;  %v2109_v25 = vld [vmem:[%s4062_s5] ss:$0 sm:$0xff]  ;;  %s3237_s5 = smov [#allocation2]  }
  0x50   :  { %2845 = vmatpush3.bf16.msra.mxu0 %v4172_v3  ;;  %2983 = vmatprep.subr.bf16.mxu1 %v2982_v34  ;;  %s2097_s18 = sshll.u32 %s3237_s5, 4  ;;  %s2098_s18 = int_to_ptr.vmem [resolvable:$true] %s2097_s18 }
  0x51   :  { %2847 = vmatprep.subr.bf16.mxu0 %v4174_v16  ;;  %2463 = vmatprep.mubr.f32.mxu0 %v4176_v22  ;;  %s3213_s19 = scalar_lea.vmem %s2098_s18, 256  ;;  %p3218_p1 = scmp.lt.s32.totalorder %s2098_s18, %s2098_s18 }
  0x52   :  { %p3214_p0 = scmp.ne.s32.totalorder %s2098_s18, %s3213_s19  ;;  %p3219_p2 = scmp.lt.s32.totalorder %s3213_s19, %s3213_s19 }
  0x53   :  { %2985 = vmatpush3.bf16.msra.mxu1 %v2982_v34  ;;  %v4182_v34 = vld [vmem:[#allocation23_spill] sm:$0xff] }
  0x54   :  { %2849 = vmatpush3.bf16.msra.mxu0 %v4174_v16  ;;  %2987 = vmatprep.subr.bf16.mxu1 %v2986_v47  ;;  %v3006_v24 = vpack.c.bf16 %v4182_v34, %v3595_v9  ;;  %v3014_v9 = vpack.c.bf16 %v3682_v37, %v3669_v38  ;;  %v3022_v38 = vpack.c.bf16 %v3696_v36, %v3694_v44  ;;  %v4189_v44 = vld [vmem:[#allocation17_spill] sm:$0xff]  ;;  %v4190_v36 = vld [vmem:[#allocation24_spill] sm:$0xff]  ;;  %p3220_p3 = por %p3219_p2, %p3218_p1 }
  0x55   :  { %2851 = vmatprep.subr.bf16.mxu0 %v4177_v54  ;;  %v3030_v37 = vpack.c.bf16 %v3721_v55, %v3705_v11  ;;  %v4194_v11 = vld [vmem:[#allocation12_spill] sm:$0xff] }
  0x56   :  { %p3221_p4 = pnand %p3220_p3, %p3214_p0 }
  0x57   :  { %2989 = vmatpush3.bf16.msra.mxu1 %v2986_v47  ;;  %v4187_v47 = vand.u32 4294901760, %v4173_v1 }
  0x58   :  { %2853 = vmatpush3.bf16.msra.mxu0 %v4177_v54  ;;  %2991 = vmatprep.subr.bf16.mxu1 %v2990_v28 }
  0x59   :  { %2855 = vmatprep.subr.bf16.mxu0 %v4178_v13 }
  0x5b   :  { %2993 = vmatpush3.bf16.msra.mxu1 %v2990_v28 }
  0x5c   :  { %2857 = vmatpush3.bf16.msra.mxu0 %v4178_v13  ;;  %2995 = vmatprep.subr.bf16.mxu1 %v2994_v60 }
  0x5d   :  { %2859 = vmatprep.subr.bf16.mxu0 %v4179_v45 }
  0x5f   :  { %2997 = vmatpush3.bf16.msra.mxu1 %v2994_v60 }
  0x60   :  { %2861 = vmatpush3.bf16.msra.mxu0 %v4179_v45  ;;  %2999 = vmatprep.subr.bf16.mxu1 %v2998_v0 }
  0x61   :  { %2863 = vmatprep.subr.bf16.mxu0 %v4180_v46 }
  0x63   :  { %3001 = vmatpush3.bf16.msra.mxu1 %v2998_v0 }
  0x64   :  { %2865 = vmatpush3.bf16.msra.mxu0 %v4180_v46  ;;  %3003 = vmatprep.subr.bf16.mxu1 %v3002_v6 }
  0x65   :  { %2867 = vmatprep.subr.bf16.mxu0 %v4181_v56 }
  0x66   :  { %2604 = vmatmul.mubr.f32.vlgmr.msra.gmra.mrb[2].mxu1 %v4183_v20 }
  0x67   :  { %3005 = vmatpush3.bf16.msra.mxu1 %v3002_v6  ;;  %2638 = vmatprep.mubr.f32.mxu1 %v4186_v39 }
  0x68   :  { %2869 = vmatpush3.bf16.msra.mxu0 %v4181_v56  ;;  %3007 = vmatprep.subr.bf16.mxu1 %v3006_v24 }
  0x69   :  { %2871 = vmatprep.subr.bf16.mxu0 %v4184_v40 }
  0x6b   :  { %3009 = vmatpush3.bf16.msra.mxu1 %v3006_v24 }
  0x6c   :  { %2873 = vmatpush3.bf16.msra.mxu0 %v4184_v40  ;;  %3011 = vmatprep.subr.bf16.mxu1 %v3010_v29 }
  0x6d   :  { %2875 = vmatprep.subr.bf16.mxu0 %v3711_v33 }
  0x6f   :  { %2464 = vmatmul.mubr.f32.vlgmr.msra.gmra.mrb[0].mxu0 %v4187_v47  ;;  %3013 = vmatpush3.bf16.msra.mxu1 %v3010_v29 }
  0x70   :  { %2877 = vmatpush3.bf16.msra.mxu0 %v3711_v33  ;;  %3015 = vmatprep.subr.bf16.mxu1 %v3014_v9  ;;  %v4195_v33 = vld [vmem:[#allocation22_spill] sm:$0xff] }
  0x71   :  { %2879 = vmatprep.subr.bf16.mxu0 %v3717_v59  ;;  %2498 = vmatprep.mubr.f32.mxu0 %v4188_v21 }
  0x73   :  { %3017 = vmatpush3.bf16.msra.mxu1 %v3014_v9 }
  0x74   :  { %2881 = vmatpush3.bf16.msra.mxu0 %v3717_v59  ;;  %3019 = vmatprep.subr.bf16.mxu1 %v3018_v32  ;;  %v4196_v59 = vand.u32 4294901760, %v4190_v36 }
  0x75   :  { %2883 = vmatprep.subr.bf16.mxu0 %v3727_v17 }
  0x77   :  { %3021 = vmatpush3.bf16.msra.mxu1 %v3018_v32 }
  0x78   :  { %2885 = vmatpush3.bf16.msra.mxu0 %v3727_v17  ;;  %3023 = vmatprep.subr.bf16.mxu1 %v3022_v38 }
  0x79   :  { %2887 = vmatprep.subr.bf16.mxu0 %v3737_v7 }
  0x7b   :  { %3025 = vmatpush3.bf16.msra.mxu1 %v3022_v38 }
  0x7c   :  { %2889 = vmatpush3.bf16.msra.mxu0 %v3737_v7  ;;  %3027 = vmatprep.subr.bf16.mxu1 %v3026_v58 }
  0x7d   :  { %2891 = vmatprep.subr.bf16.mxu0 %v3746_v27 }
  0x7f   :  { %3029 = vmatpush3.bf16.msra.mxu1 %v3026_v58 }
  0x80   :  { %2893 = vmatpush3.bf16.msra.mxu0 %v3746_v27  ;;  %3031 = vmatprep.subr.bf16.mxu1 %v3030_v37 }
  0x81   :  { %2895 = vmatprep.subr.bf16.mxu0 %v3752_v52 }
  0x83   :  { %3033 = vmatpush3.bf16.msra.mxu1 %v3030_v37 }
  0x84   :  { %2897 = vmatpush3.bf16.msra.mxu0 %v3752_v52  ;;  %3035 = vmatprep.subr.bf16.mxu1 %v4189_v44 }
  0x85   :  { %2899 = vmatprep.subr.bf16.mxu0 %v3759_v15 }
  0x86   :  { %2639 = vmatmul.mubr.f32.vlgmr.msra.gmra.mrb[2].mxu1 %v4190_v36 }
  0x87   :  { %3037 = vmatpush3.bf16.msra.mxu1 %v4189_v44  ;;  %2673 = vmatprep.mubr.f32.mxu1 %v4192_v41 }
  0x88   :  { %2901 = vmatpush3.bf16.msra.mxu0 %v3759_v15  ;;  %3039 = vmatprep.subr.bf16.mxu1 %v4191_v19 }
  0x89   :  { %2903 = vmatprep.subr.bf16.mxu0 %v3765_v42 }
  0x8b   :  { %3041 = vmatpush3.bf16.msra.mxu1 %v4191_v19 }
  0x8c   :  { %2905 = vmatpush3.bf16.msra.mxu0 %v3765_v42  ;;  %3043 = vmatprep.subr.bf16.mxu1 %v4193_v57 }
  0x8d   :  { %2907 = vmatprep.subr.bf16.mxu0 %v4172_v3 }
  0x8f   :  { %2499 = vmatmul.mubr.f32.vlgmr.msra.gmra.mrb[0].mxu0 %v4194_v11  ;;  %3045 = vmatpush3.bf16.msra.mxu1 %v4193_v57 }
  0x90   :  { %2909 = vmatpush3.bf16.msra.mxu0 %v4172_v3  ;;  %3047 = vmatprep.subr.bf16.mxu1 %v4195_v33 }
  0x91   :  { %2911 = vmatprep.subr.bf16.mxu0 %v4174_v16  ;;  %2533 = vmatprep.mubr.f32.mxu0 %v4188_v21 }
  0x93   :  { %3049 = vmatpush3.bf16.msra.mxu1 %v4195_v33 }
  0x94   :  { %2913 = vmatpush3.bf16.msra.mxu0 %v4174_v16  ;;  %3051 = vmatprep.subr.bf16.mxu1 %v3616_v8 }
  0x95   :  { %2915 = vmatprep.subr.bf16.mxu0 %v4177_v54 }
  0x97   :  { %3053 = vmatpush3.bf16.msra.mxu1 %v3616_v8 }
  0x98   :  { %2917 = vmatpush3.bf16.msra.mxu0 %v4177_v54  ;;  %3055 = vmatprep.subr.bf16.mxu1 %v3634_v53 }
  0x99   :  { %2919 = vmatprep.subr.bf16.mxu0 %v4178_v13 }
  0x9b   :  { %3057 = vmatpush3.bf16.msra.mxu1 %v3634_v53 }
  0x9c   :  { %2921 = vmatpush3.bf16.msra.mxu0 %v4178_v13  ;;  %3059 = vmatprep.subr.bf16.mxu1 %v3646_v18 }
  0x9d   :  { %2923 = vmatprep.subr.bf16.mxu0 %v4179_v45 }
  0x9f   :  { %3061 = vmatpush3.bf16.msra.mxu1 %v3646_v18 }
  0xa0   :  { %2925 = vmatpush3.bf16.msra.mxu0 %v4179_v45  ;;  %3063 = vmatprep.subr.bf16.mxu1 %v3656_v61 }
  0xa1   :  { %2927 = vmatprep.subr.bf16.mxu0 %v4180_v46 }
  0xa3   :  { %3065 = vmatpush3.bf16.msra.mxu1 %v3656_v61 }
  0xa4   :  { %2929 = vmatpush3.bf16.msra.mxu0 %v4180_v46  ;;  %3067 = vmatprep.subr.bf16.mxu1 %v3771_v30 }
  0xa5   :  { %2931 = vmatprep.subr.bf16.mxu0 %v4181_v56 }
  0xa6   :  { %2674 = vmatmul.mubr.f32.vlgmr.msra.gmra.mrb[2].mxu1 %v4196_v59 }
  0xa7   :  { %3069 = vmatpush3.bf16.msra.mxu1 %v3771_v30  ;;  %2708 = vmatprep.mubr.f32.mxu1 %v3521_v63 }
  0xa8   :  { %2933 = vmatpush3.bf16.msra.mxu0 %v4181_v56  ;;  %3071 = vmatprep.subr.bf16.mxu1 %v3776_v49 }
  0xa9   :  { %2935 = vmatprep.subr.bf16.mxu0 %v4184_v40 }
  0xab   :  { %3073 = vmatpush3.bf16.msra.mxu1 %v3776_v49 }
  0xac   :  { %2937 = vmatpush3.bf16.msra.mxu0 %v4184_v40  ;;  %3075 = vmatprep.subr.bf16.mxu1 %v3778_v50 }
  0xaf   :  { %2534 = vmatmul.mubr.f32.vlgmr.msra.gmra.mrb[0].mxu0 %v4194_v11  ;;  %3077 = vmatpush3.bf16.msra.mxu1 %v3778_v50 }
  0xb0   :  { %3079 = vmatprep.subr.bf16.mxu1 %v3780_v12 }
  0xb3   :  { %3081 = vmatpush3.bf16.msra.mxu1 %v3780_v12 }
  0xb4   :  { %3083 = vmatprep.subr.bf16.mxu1 %v3783_v48 }
  0xb7   :  { %3085 = vmatpush3.bf16.msra.mxu1 %v3783_v48 }
  0xb8   :  { %3087 = vmatprep.subr.bf16.mxu1 %v3785_v62 }
  0xbb   :  { %3089 = vmatpush3.bf16.msra.mxu1 %v3785_v62 }
  0xbc   :  { %3091 = vmatprep.subr.bf16.mxu1 %v3787_v4 }
  0xbf   :  { %3093 = vmatpush3.bf16.msra.mxu1 %v3787_v4 }
  0xc0   :  { %3095 = vmatprep.subr.bf16.mxu1 %v3797_v26 }
  0xc3   :  { %3097 = vmatpush3.bf16.msra.mxu1 %v3797_v26 }
  0xc4   :  { %3099 = vmatprep.subr.bf16.mxu1 %v4189_v44 }
  0xc6   :  { %2709 = vmatmul.mubr.f32.vlgmr.msra.gmra.mrb[2].mxu1 %v4183_v20 }
  0xc7   :  { %3101 = vmatpush3.bf16.msra.mxu1 %v4189_v44  ;;  %2743 = vmatprep.mubr.f32.mxu1 %v3521_v63 }
  0xc8   :  { %3103 = vmatprep.subr.bf16.mxu1 %v4191_v19 }
  0xcb   :  { %3105 = vmatpush3.bf16.msra.mxu1 %v4191_v19 }
  0xcc   :  { %3107 = vmatprep.subr.bf16.mxu1 %v4193_v57 }
  0xcf   :  { %3109 = vmatpush3.bf16.msra.mxu1 %v4193_v57 }
  0xd0   :  { %3111 = vmatprep.subr.bf16.mxu1 %v4195_v33 }
  0xd3   :  { %3113 = vmatpush3.bf16.msra.mxu1 %v4195_v33 }
  0xd4   :  { %3115 = vmatprep.subr.bf16.mxu1 %v3616_v8 }
  0xd7   :  { %3117 = vmatpush3.bf16.msra.mxu1 %v3616_v8  ;;  %v2108_v8 = vld [vmem:[%s4060_s3] ss:$0 sm:$0xff] }
  0xd8   :  { %3119 = vmatprep.subr.bf16.mxu1 %v3634_v53 }
  0xdb   :  { %3121 = vmatpush3.bf16.msra.mxu1 %v3634_v53 }
  0xdc   :  { %3123 = vmatprep.subr.bf16.mxu1 %v3646_v18 }
  0xdf   :  { %3125 = vmatpush3.bf16.msra.mxu1 %v3646_v18 }
  0xe0   :  { %3127 = vmatprep.subr.bf16.mxu1 %v3656_v61 }
  0xe3   :  { %3129 = vmatpush3.bf16.msra.mxu1 %v3656_v61 }
  0xe6   :  { %2744 = vmatmul.mubr.f32.vlgmr.msra.gmra.mrb[2].mxu1 %v4183_v20 }
  0xf9   :  { %v2360_v63 = vpop.f32.mrb[0].mxu1 }
  0xfa   :  { %v136_v55 = vpop.f32.mrb[1].mxu1  ;;  %v147_v17 = vadd.f32 %v2360_v63, %v2108_v8 }
  0xfb   :  { %v137_v7 = vadd.f32 %v2108_v8, %v136_v55 }
 0x182   :  { %v2535_v27 = vpop.f32.mrb[0].mxu0 }
 0x183   :  { %v3155_v53 = vadd.f32 %v2535_v27, %v147_v17  ;;  %v723_v52 = vpop.f32.mrb[1].mxu0 }
 0x184   :  { %v3157_v15 = vadd.f32 %v723_v52, %v137_v7  ;;  %v2012_v7 = vlaneseq }
 0x185   :  { %v734_v42 = vmul.f32 3.0, %v3155_v53 }
 0x186   :  { %v733_v18 = vmul.f32 3.0, %v3157_v15  ;;  %v4001_v27 = vand.u32 127, %v2012_v7 }
 0x187   :  { %3201 = vtanh.f32 %v734_v42 }
 0x188   :  { %3203 = vtanh.f32 %v733_v18  ;;  %vm2015_vm0 = vcmp.lt.s32.totalorder %v4001_v27, 16 }
 0x191   :  { %v3202_v30 = vpop.eup %3201 }
 0x192   :  { %v3204_v61 = vpop.eup %3203  ;;  %v3957_v49 = vand.u32 4294901760, %v3202_v30 }
 0x193   :  { %v3959_v50 = vand.u32 4294901760, %v3204_v61 }
 0x194   :  { %v3962_v12 = vsub.f32 %v3202_v30, %v3957_v49 }
 0x195   :  { %v3965_v48 = vsub.f32 %v3204_v61, %v3959_v50  ;;  %v3969_v62 = vpack.c.bf16 %v3957_v49, %v3959_v50  ;;  %v4019_v61 = vcvt.s32.f32 %v4001_v27 }
 0x196   :  { %v3972_v4 = vand.u32 4294901760, %v3962_v12 }
 0x197   :  { %3131 = vmatprep.subr.bf16.mxu0 %v3969_v62  ;;  %v3976_v26 = vand.u32 4294901760, %v3965_v48  ;;  %v3138_v3 = vpack.c.bf16 %v3962_v12, %v3965_v48 }
 0x198   :  { %v1544_v1 = vsub.f32 %v3962_v12, %v3972_v4 }
 0x199   :  { %v1529_v16 = vsub.f32 %v3965_v48, %v3976_v26  ;;  %v3146_v51 = vpack.c.bf16 %v3972_v4, %v3976_v26 }
 0x19a   :  { %v1545_v10 = vand.u32 4294901760, %v1544_v1 }
 0x19b   :  { %v1530_v2 = vand.u32 4294901760, %v1529_v16 }
 0x19d   :  { %v3134_v22 = vpack.c.bf16 %v1545_v10, %v1530_v2 }
 0x1b9   :  { %v2745_v54 = vpop.f32.mrb[2].mxu1 }
 0x1ba   :  { %v3158_v28 = vadd.f32 %v2745_v54, %v2109_v25  ;;  %v1436_v31 = vpop.f32.mrb[3].mxu1 }
 0x1bb   :  { %v3159_v14 = vadd.f32 %v2109_v25, %v1436_v31 }
 0x1bc   :  { %v1447_v35 = vmul.f32 3.0, %v3158_v28 }
 0x1bd   :  { %v1446_v13 = vmul.f32 3.0, %v3159_v14 }
 0x1be   :  { %3205 = vtanh.f32 %v1447_v35 }
 0x1bf   :  { %3207 = vtanh.f32 %v1446_v13 }
 0x1c8   :  { %v3206_v60 = vpop.eup %3205 }
 0x1c9   :  { %v3208_v43 = vpop.eup %3207  ;;  %v1458_v5 = vand.u32 4294901760, %v3206_v60  ;;  %v1451_v45 = vsub.f32 0.0, %v3206_v60 }
 0x1ca   :  { %v1454_v0 = vand.u32 4294901760, %v3208_v43  ;;  %v1450_v46 = vsub.f32 0.0, %v3208_v43 }
 0x1cb   :  { %v1570_v6 = vsub.f32 %v3206_v60, %v1458_v5  ;;  %v1535_v56 = vand.u32 4294901760, %v1451_v45 }
 0x1cc   :  { %v3132_v34 = vpack.c.bf16 %v1458_v5, %v1454_v0  ;;  %v1558_v24 = vsub.f32 %v3208_v43, %v1454_v0  ;;  %v1520_v20 = vand.u32 4294901760, %v1450_v46 }
 0x1cd   :  { %v1571_v40 = vand.u32 4294901760, %v1570_v6  ;;  %v1536_v23 = vsub.f32 %v1451_v45, %v1535_v56 }
 0x1ce   :  { %3133 = vmatpush1.bf16.xpose.msra.mxu0 %v3132_v34  ;;  %v1521_v29 = vsub.f32 %v1450_v46, %v1520_v20  ;;  %v1559_v39 = vand.u32 4294901760, %v1558_v24  ;;  %v3140_v9 = vpack.c.bf16 %v1570_v6, %v1558_v24 }
 0x1cf   :  { %3135 = vmatprep.subr.bf16.mxu0 %v3134_v22  ;;  %v1572_v47 = vsub.f32 %v1570_v6, %v1571_v40  ;;  %v1537_v32 = vand.u32 4294901760, %v1536_v23 }
 0x1d0   :  { %v1522_v21 = vand.u32 4294901760, %v1521_v29  ;;  %v1560_v38 = vsub.f32 %v1558_v24, %v1559_v39  ;;  %v3148_v58 = vpack.c.bf16 %v1571_v40, %v1559_v39 }
 0x1d1   :  { %v1573_v37 = vand.u32 4294901760, %v1572_v47  ;;  %v1538_v19 = vsub.f32 %v1536_v23, %v1537_v32 }
 0x1d2   :  { %v1523_v44 = vsub.f32 %v1521_v29, %v1522_v21  ;;  %v1561_v36 = vand.u32 4294901760, %v1560_v38 }
 0x1d3   :  { %v1539_v11 = vand.u32 4294901760, %v1538_v19 }
 0x1d4   :  { %v1524_v41 = vand.u32 4294901760, %v1523_v44  ;;  %v3136_v57 = vpack.c.bf16 %v1573_v37, %v1561_v36 }
 0x1d6   :  { %1525 = vmatprep.mubr.f32.mxu0 %v1524_v41 }
 0x1d7   :  { %1531 = vmatmul.mubr.f32.vlgmr.msra.gmra.mrb[2].mxu0 %v1530_v2 }
 0x1d8   :  { %3137 = vmatpush1.bf16.xpose.msra.mxu0 %v3136_v57  ;;  %1540 = vmatprep.mubr.f32.mxu0 %v1539_v11 }
 0x1d9   :  { %3139 = vmatprep.subr.bf16.mxu0 %v3138_v3 }
 0x1db   :  { %1546 = vmatmul.mubr.f32.gmra.mrb[4].mxu0 %v1545_v10 }
 0x1dc   :  { %1636 = vmatprep.mubr.f32.mxu0 %v1520_v20 }
 0x1df   :  { %1638 = vmatmul.mubr.f32.vlgmr.msra.gmra.mrb[2].mxu0 %v3959_v50 }
 0x1e0   :  { %3141 = vmatpush1.bf16.xpose.msra.mxu0 %v3140_v9  ;;  %1643 = vmatprep.mubr.f32.mxu0 %v1535_v56 }
 0x1e1   :  { %3143 = vmatprep.subr.bf16.mxu0 %v3969_v62 }
 0x1e3   :  { %1645 = vmatmul.mubr.f32.gmra.mrb[4].mxu0 %v3957_v49 }
 0x1e4   :  { %1724 = vmatprep.mubr.f32.mxu0 %v1521_v29 }
 0x1e7   :  { %1727 = vmatmul.mubr.f32.vlgmr.msra.gmra.mrb[2].mxu0 %v3965_v48 }
 0x1e8   :  { %3145 = vmatpush1.bf16.xpose.msra.mxu0 %v3132_v34  ;;  %1733 = vmatprep.mubr.f32.mxu0 %v1536_v23 }
 0x1e9   :  { %3147 = vmatprep.subr.bf16.mxu0 %v3146_v51 }
 0x1eb   :  { %1736 = vmatmul.mubr.f32.gmra.mrb[4].mxu0 %v3962_v12 }
 0x1ec   :  { %1812 = vmatprep.mubr.f32.mxu0 %v1522_v21 }
 0x1ef   :  { %1816 = vmatmul.mubr.f32.vlgmr.msra.gmra.mrb[2].mxu0 %v3976_v26 }
 0x1f0   :  { %3149 = vmatpush1.bf16.xpose.msra.mxu0 %v3148_v58  ;;  %1823 = vmatprep.mubr.f32.mxu0 %v1537_v32 }
 0x1f1   :  { %3151 = vmatprep.subr.bf16.mxu0 %v3969_v62 }
 0x1f3   :  { %1827 = vmatmul.mubr.f32.gmra.mrb[4].mxu0 %v3972_v4 }
 0x1f4   :  { %1909 = vmatprep.mubr.f32.mxu0 %v1520_v20 }
 0x1f7   :  { %1911 = vmatmul.mubr.f32.vlgmr.msra.gmra.mrb[2].mxu0 %v3959_v50 }
 0x1f8   :  { %3153 = vmatpush1.bf16.xpose.msra.mxu0 %v3132_v34  ;;  %1916 = vmatprep.mubr.f32.mxu0 %v1535_v56 }
 0x1fb   :  { %1918 = vmatmul.mubr.f32.gmra.mrb[4].mxu0 %v3957_v49 }
 0x1fc   :  { %1992 = vmatprep.mubr.f32.mxu0 %v1520_v20 }
 0x1ff   :  { %1994 = vmatmul.mubr.f32.vlgmr.msra.gmra.mrb[2].mxu0 %v3959_v50 }
 0x200   :  { %1999 = vmatprep.mubr.f32.mxu0 %v1535_v56 }
 0x203   :  { %2001 = vmatmul.mubr.f32.gmra.mrb[4].mxu0 %v3957_v49 }
 0x2d2   :  { %v1995_v33 = vpop.f32.mrb[2].mxu0 }
 0x2d3   :  { %v2006_v59 = vmul.f32 3.0, %v1995_v33  ;;  %v1997_v63 = vpop.f32.mrb[3].mxu0 }
 0x2d5   :  { %3209 = vtanh.f32 %v2006_v59 }
 0x2d6   :  { %v2002_v55 = vpop.f32.mrb[4].mxu0 }
 0x2d7   :  { %v2007_v8 = vmul.f32 3.0, %v2002_v55  ;;  %v2004_v17 = vpop.f32.mrb[5].mxu0 }
 0x2d9   :  { %3211 = vtanh.f32 %v2007_v8 }
 0x2df   :  { %v4003_v53 = vpop.eup %3209 }
 0x2e0   :  { %v2010_v52 = vmax.f32 %v4003_v53, 0.0 }
 0x2e2   :  { %v2018_v15 = vsel %vm2015_vm0, %v2010_v52, -1.0 }
 0x2e3   :  { %v4011_v42 = vpop.eup %3211  ;;  %2020 = vmax.xlane.f32.xlu0 %v2018_v15 }
 0x2e4   :  { %v2011_v18 = vmax.f32 %v4011_v42, 0.0 }
 0x2e6   :  { %v2019_v30 = vsel %vm2015_vm0, %v2011_v18, -1.0 }
 0x2e7   :  { %2022 = vmax.xlane.f32.xlu0 %v2019_v30 }
 0x370   :  { %v2021_v49 = vpop.xlane.xlu0 %2020 }
 0x371   :  { %vm2024_vm1 = vcmp.eq.f32.partialorder %v2018_v15, %v2021_v49 }
 0x372   :  { %v2026_v50 = vsel %vm2024_vm1, %v4019_v61, 128.0 }
 0x373   :  { %2028 = vmin.xlane.f32.xlu1 %v2026_v50 }
 0x374   :  { %v2023_v12 = vpop.xlane.xlu0 %2022 }
 0x375   :  { %vm2025_vm2 = vcmp.eq.f32.partialorder %v2019_v30, %v2023_v12 }
 0x376   :  { %v2027_v48 = vsel %vm2025_vm2, %v4019_v61, 128.0 }
 0x377   :  { %2030 = vmin.xlane.f32.xlu1 %v2027_v48 }
 0x400   :  { %v2029_v62 = vpop.xlane.xlu1 %2028 }
 0x401   :  { %vm2032_vm3 = vcmp.eq.f32.partialorder %v4019_v61, %v2029_v62 }
 0x402   :  { %v2034_v4 = vsel %vm2032_vm3, -1.0, %v2018_v15 }
 0x403   :  { %2036 = vmax.xlane.f32.xlu0 %v2034_v4 }
 0x404   :  { %v2031_v26 = vpop.xlane.xlu1 %2030 }
 0x405   :  { %vm2033_vm4 = vcmp.eq.f32.partialorder %v4019_v61, %v2031_v26 }
 0x406   :  { %v2035_v3 = vsel %vm2033_vm4, -1.0, %v2019_v30 }
 0x407   :  { %2038 = vmax.xlane.f32.xlu1 %v2035_v3 }
 0x490   :  { %v2037_v1 = vpop.xlane.xlu0 %2036 }
 0x491   :  { %vm2040_vm5 = vcmp.eq.f32.partialorder %v2034_v4, %v2037_v1 }
 0x492   :  { %v2042_v16 = vsel %vm2040_vm5, %v4019_v61, 128.0 }
 0x493   :  { %2044 = vmin.xlane.f32.xlu0 %v2042_v16 }
 0x494   :  { %v2039_v51 = vpop.xlane.xlu1 %2038 }
 0x495   :  { %vm2041_vm6 = vcmp.eq.f32.partialorder %v2035_v3, %v2039_v51 }
 0x496   :  { %v2043_v10 = vsel %vm2041_vm6, %v4019_v61, 128.0 }
 0x497   :  { %2046 = vmin.xlane.f32.xlu1 %v2043_v10 }
 0x520   :  { %v2045_v2 = vpop.xlane.xlu0 %2044 }
 0x521   :  { %vm2048_vm7 = vcmp.eq.f32.partialorder %v4019_v61, %v2045_v2 }
 0x522   :  { %v2050_v22 = vsel %vm2048_vm7, -1.0, %v2034_v4 }
 0x523   :  { %2052 = vmax.xlane.f32.xlu0 %v2050_v22 }
 0x524   :  { %v2047_v25 = vpop.xlane.xlu1 %2046 }
 0x525   :  { %vm2049_vm8 = vcmp.eq.f32.partialorder %v4019_v61, %v2047_v25 }
 0x526   :  { %v2051_v54 = vsel %vm2049_vm8, -1.0, %v2035_v3 }
 0x527   :  { %2054 = vmax.xlane.f32.xlu1 %v2051_v54 }
 0x5b0   :  { %v2053_v28 = vpop.xlane.xlu0 %2052 }
 0x5b1   :  { %vm2056_vm9 = vcmp.eq.f32.partialorder %v2050_v22, %v2053_v28 }
 0x5b2   :  { %v2058_v31 = vsel %vm2056_vm9, %v4019_v61, 128.0 }
 0x5b3   :  { %2060 = vmin.xlane.f32.xlu0 %v2058_v31 }
 0x5b4   :  { %v2055_v14 = vpop.xlane.xlu1 %2054 }
 0x5b5   :  { %vm2057_vm10 = vcmp.eq.f32.partialorder %v2051_v54, %v2055_v14 }
 0x5b6   :  { %v2059_v35 = vsel %vm2057_vm10, %v4019_v61, 128.0 }
 0x5b7   :  { %2062 = vmin.xlane.f32.xlu1 %v2059_v35 }
 0x640   :  { %v2061_v13 = vpop.xlane.xlu0 %2060 }
 0x641   :  { %vm2064_vm11 = vcmp.eq.f32.partialorder %v4019_v61, %v2061_v13 }
 0x642   :  { %v2066_v60 = vsel %vm2064_vm11, -1.0, %v2050_v22 }
 0x643   :  { %2068 = vmax.xlane.f32.xlu0 %v2066_v60 }
 0x644   :  { %v2063_v43 = vpop.xlane.xlu1 %2062 }
 0x645   :  { %vm2065_vm12 = vcmp.eq.f32.partialorder %v4019_v61, %v2063_v43 }
 0x646   :  { %v2067_v5 = vsel %vm2065_vm12, -1.0, %v2051_v54 }
 0x647   :  { %2070 = vmax.xlane.f32.xlu1 %v2067_v5 }
 0x6d0   :  { %v2069_v45 = vpop.xlane.xlu0 %2068 }
 0x6d1   :  { %vm2072_vm13 = vcmp.eq.f32.partialorder %v2066_v60, %v2069_v45 }
 0x6d2   :  { %v2074_v0 = vsel %vm2072_vm13, %v4019_v61, 128.0 }
 0x6d3   :  { %2076 = vmin.xlane.f32.xlu0 %v2074_v0 }
 0x6d4   :  { %v2071_v46 = vpop.xlane.xlu1 %2070 }
 0x6d5   :  { %vm2073_vm14 = vcmp.eq.f32.partialorder %v2067_v5, %v2071_v46 }
 0x6d6   :  { %v2075_v6 = vsel %vm2073_vm14, %v4019_v61, 128.0 }
 0x6d7   :  { %2078 = vmin.xlane.f32.xlu1 %v2075_v6 }
 0x760   :  { %v2077_v56 = vpop.xlane.xlu0 %2076 }
 0x761   :  { %vm2080_vm15 = vcmp.eq.f32.partialorder %v4019_v61, %v2077_v56 }
 0x762   :  { %v2082_v34 = vsel %vm2080_vm15, -1.0, %v2066_v60 }
 0x763   :  { %vm2084_vm1 = vcmp.lt.f32.partialorder %v2082_v34, 0.0 }
 0x764   :  { %vm2086_vm2 = vmand %vm2084_vm1, %vm2015_vm0  ;;  %v2079_v24 = vpop.xlane.xlu1 %2078 }
 0x765   :  { %v2088_v20 = vsel %vm2086_vm2, %v2010_v52, 0.0  ;;  %vm2081_vm3 = vcmp.eq.f32.partialorder %v4019_v61, %v2079_v24 }
 0x766   :  { %2090 = vst [vmem:[#allocation2] sm:$0xff] %v2088_v20  ;;  %v2083_v40 = vsel %vm2081_vm3, -1.0, %v2067_v5 }
 0x767   :  { %vm2085_vm4 = vcmp.lt.f32.partialorder %v2083_v40, 0.0 }
 0x768   :  { %vm2087_vm5 = vmand %vm2085_vm4, %vm2015_vm0 }
 0x769   :  { %v2089_v23 = vsel %vm2087_vm5, %v2011_v18, 0.0 }
 0x76a   :  { %2091 = vst [vmem:[#allocation2 + $0x8] sm:$0xff] %v2089_v23 }
 0x76b   :  { %3224 = shalt.err (!%p3221_p4)
}
 0x76c   :  { %s3225_s22 = scalar_lea.hbm %s4063_s6, 256 }
 0x76d   :  { %p3226_p5 = scmp.ne.s32.totalorder %s4063_s6, %s3225_s22  ;;  %p3229_p6 = scmp.lt.u32.totalorder %s3225_s22, %s4063_s6 }
 0x76f   :  { %p3231_p7 = pnand %p3229_p6, %p3226_p5 }
 0x771   :  { %3234 = shalt.err (!%p3231_p7)
}
 0x772   :  { %s3238_s27 = smov 128   ;;  %s3239_s28 = smov 8  }
 0x773   :  { %2103 = dma.vmem_to_hbm [thread:$0]  %s2098_s18, 256, %s4063_s6, [#allocation3], %s3238_s27, %s3238_s27, %s3239_s28  }
 0x774   :  { %3235 = dma.done.wait [#allocation3], 256  }
 0x775   :  { %3236 = vsyncadd [#allocation3], 4294967040 }
 0x776   :  { %2107 = vsyncpa [#allocation3], 1 }

</bundles_post_ra>
